<compile_context>
chip_gen: v7x
topology: tpu7x:2x2x1
jax: 0.10.0
libtpu: 0.0.40
codegen_flags: <defaults>
</compile_context>

<pallas_src>
import functools

import jax
import jax.numpy as jnp
from jax.experimental import pallas as pl
from jax.experimental.pallas import tpu as pltpu


def _round_up(x: int, m: int) -> int:
    return ((x + m - 1) // m) * m


def _cdiv(a: int, b: int) -> int:
    return (a + b - 1) // b


def _choose_tile(dim: int, max_tile: int, align: int) -> int:
    """Pick a block size along one dimension.

    * dim <= max_tile: use the exact dim (a block dim equal to the full array
      dim is always a legal TPU block shape) -> no padding, no masking.
    * dim >  max_tile: balanced block size, rounded up to `align`, so the last
      (partial) block wastes as little work as possible.
    """
    if dim <= max_tile:
        return dim
    nblocks = _cdiv(dim, max_tile)
    return _round_up(_cdiv(dim, nblocks), align)


def _linear_kernel(x_ref, w_ref, b_ref, o_ref, *, k_rem):
    # x_ref: (tm, tk) input dtype   w_ref: (tk, tn) input dtype
    # b_ref: (1,  tn) f32           o_ref: (tm, tn) f32  (doubles as accumulator)
    k = pl.program_id(2)
    nk = pl.num_programs(2)

    @pl.when(k == 0)
    def _init():
        # Fold the bias add into the accumulator init -> no finalize pass.
        o_ref[...] = jnp.broadcast_to(b_ref[...], o_ref.shape)

    def _accum(x, w):
        o_ref[...] += jnp.dot(
            x.astype(jnp.bfloat16),
            w.astype(jnp.bfloat16),
            preferred_element_type=jnp.float32,
        )

    if k_rem == 0:
        _accum(x_ref[...], w_ref[...])
    else:
        # K does not divide evenly: zero-mask the garbage tail of the last K
        # block (in-kernel, instead of a wrapper-side zero-pad pass over HBM).
        @pl.when(k < nk - 1)
        def _full():
            _accum(x_ref[...], w_ref[...])

        @pl.when(k == nk - 1)
        def _tail():
            x = x_ref[...]
            w = w_ref[...]
            col = jax.lax.broadcasted_iota(jnp.int32, x.shape, 1)
            row = jax.lax.broadcasted_iota(jnp.int32, w.shape, 0)
            x = jnp.where(col < k_rem, x, jnp.zeros_like(x))
            w = jnp.where(row < k_rem, w, jnp.zeros_like(w))
            _accum(x, w)


@functools.partial(jax.jit, static_argnames=("tile_m", "tile_n", "tile_k"))
def linear_classifier(x, weight_t, bias=None, *, tile_m=512, tile_n=512, tile_k=1024):
    """y = x @ weight_t + bias   (nn.Linear forward, weight pre-transposed).

    x:        [M, in_dim]
    weight_t: [in_dim, out_dim]  (transpose of torch's [out_dim, in_dim] weight)
    bias:     [out_dim] or None
    Returns:  [M, out_dim] float32
    """
    M, K = x.shape
    K_w, N = weight_t.shape
    assert K == K_w, "in_dim mismatch between x and weight"
    if bias is None:
        bias = jnp.zeros((N,), jnp.float32)
    b2d = bias.astype(jnp.float32).reshape(1, N)

    # ---- tile selection (no full-tile rounding of the problem dims) ----
    tm = _choose_tile(M, tile_m, 8)
    tn = _choose_tile(N, tile_n, 128)
    tk = _choose_tile(K, tile_k, 128)

    grid_m = _cdiv(M, tm)
    grid_n = _cdiv(N, tn)

    # v7x has 2 TensorCores sharding the 'parallel' axes: make sure they get at
    # least 2 tiles when the problem is big enough for the extra step to be free.
    if grid_m * grid_n < 2 and M >= 256:
        tm = _round_up(_cdiv(M, 2), 8)
        grid_m = _cdiv(M, tm)

    grid_k = _cdiv(K, tk)
    k_rem = K % tk  # static; nonzero -> last K block is partial and gets masked

    grid = (grid_m, grid_n, grid_k)

    cost = pl.CostEstimate(
        flops=2 * M * K * N,
        transcendentals=0,
        bytes_accessed=(
            x.dtype.itemsize * M * K * grid_n          # x re-read per N tile
            + weight_t.dtype.itemsize * K * N * grid_m  # W re-read per M tile
            + 4 * M * N                                 # output written once
            + 4 * N * grid_m                            # bias re-reads
        ),
    )

    out = pl.pallas_call(
        functools.partial(_linear_kernel, k_rem=k_rem),
        out_shape=jax.ShapeDtypeStruct((M, N), jnp.float32),
        grid_spec=pltpu.PrefetchScalarGridSpec(
            num_scalar_prefetch=0,
            grid=grid,
            in_specs=[
                pl.BlockSpec((tm, tk), lambda i, j, k: (i, k)),   # x tile
                pl.BlockSpec((tk, tn), lambda i, j, k: (k, j)),   # weight tile
                pl.BlockSpec((1, tn), lambda i, j, k: (0, j)),    # bias tile
            ],
            out_specs=pl.BlockSpec((tm, tn), lambda i, j, k: (i, j)),
        ),
        compiler_params=pltpu.CompilerParams(
            dimension_semantics=("parallel", "parallel", "arbitrary"),
            vmem_limit_bytes=48 << 20,  # ~10 MiB actually used with default tiles
        ),
        cost_estimate=cost,
    )(x, weight_t, b2d)

    return out


def xavier_init_weight(key, in_dim, out_dim):
    # torch.nn.init.xavier_uniform_: U(-a, a), a = sqrt(6 / (fan_in + fan_out))
    limit = (6.0 / (in_dim + out_dim)) ** 0.5
    # torch weight shape is [out_dim, in_dim]; store its transpose for the kernel.
    w = jax.random.uniform(key, (out_dim, in_dim), jnp.float32, -limit, limit)
    return w.T  # [in_dim, out_dim]


if __name__ == "__main__":
    # Small shapes consistent with the module: batch=8, in_dim=32, out_dim=16.
    # These collapse to a single-block (1,1,1) grid inside the kernel.
    batch, in_dim, out_dim = 8, 32, 16

    key = jax.random.PRNGKey(0)
    kx, kw = jax.random.split(key)

    x = jax.random.normal(kx, (batch, in_dim), jnp.float32)
    weight_t = xavier_init_weight(kw, in_dim, out_dim)   # xavier_init
    bias = jnp.zeros((out_dim,), jnp.float32)            # bias_init (zeros)

    y = linear_classifier(x, weight_t, bias)
    y = jax.block_until_ready(y)
    assert y.shape == (batch, out_dim)
    assert y.dtype == jnp.float32

    # Reference with matching bf16 operand precision (f32 accumulation).
    x_bf = x.astype(jnp.bfloat16).astype(jnp.float32)
    w_bf = weight_t.astype(jnp.bfloat16).astype(jnp.float32)
    y_ref_bf16 = x_bf @ w_bf + bias
    assert jnp.allclose(y, y_ref_bf16, atol=1e-4, rtol=1e-4)

    # Loose sanity check against full-f32 reference (bf16 operand rounding only).
    y_ref_f32 = x @ weight_t + bias
    assert jnp.allclose(y, y_ref_f32, atol=5e-2, rtol=5e-2)

    print("KERNEL_OK")
</pallas_src>

<mosaic_0001>
module attributes {stable_mosaic.version = 11 : i64} {
  func.func @_linear_kernel(%arg0: i32, %arg1: i32, %arg2: i32, %arg3: memref<8x32xf32, #tpu.memory_space<vmem>>, %arg4: memref<32x16xf32, #tpu.memory_space<vmem>>, %arg5: memref<1x16xf32, #tpu.memory_space<vmem>>, %arg6: memref<8x16xf32, #tpu.memory_space<vmem>>) attributes {dimension_semantics = [#tpu.dimension_semantics<parallel>, #tpu.dimension_semantics<parallel>, #tpu.dimension_semantics<arbitrary>], iteration_bounds = array<i64: 1, 1, 1>, scalar_prefetch = 0 : i64, scratch_operands = 0 : i64, tpu.core_type = #tpu.core_type<tc>, window_params = [{transform_indices = @transform_0, window_bounds = array<i64: 8, 32>}, {transform_indices = @transform_1, window_bounds = array<i64: 32, 16>}, {transform_indices = @transform_2, window_bounds = array<i64: 1, 16>}, {transform_indices = @transform_3, window_bounds = array<i64: 8, 16>}]} {
    %c0_i32 = arith.constant 0 : i32
    %0 = arith.cmpi eq, %arg2, %c0_i32 : i32
    %1 = arith.extui %0 : i1 to i32
    %c0_i32_0 = arith.constant 0 : i32
    %2 = arith.cmpi ne, %1, %c0_i32_0 : i32
    scf.if %2 {
      %c0_8 = arith.constant 0 : index
      %c0_9 = arith.constant 0 : index
      %11 = vector.load %arg5[%c0_8, %c0_9] : memref<1x16xf32, #tpu.memory_space<vmem>>, vector<1x16xf32>
      %12 = vector.shape_cast %11 : vector<1x16xf32> to vector<1x16xf32>
      %13 = vector.broadcast %12 : vector<1x16xf32> to vector<8x16xf32>
      %c0_10 = arith.constant 0 : index
      %c0_11 = arith.constant 0 : index
      %14 = vector.load %arg6[%c0_10, %c0_11] : memref<8x16xf32, #tpu.memory_space<vmem>>, vector<8x16xf32>
      tpu.vector_store %arg6[%c0_10, %c0_11], %13 {strides = array<i32>} : memref<8x16xf32, #tpu.memory_space<vmem>>, vector<8x16xf32>,
    } else {
    }
    %c0 = arith.constant 0 : index
    %c0_1 = arith.constant 0 : index
    %3 = vector.load %arg3[%c0, %c0_1] : memref<8x32xf32, #tpu.memory_space<vmem>>, vector<8x32xf32>
    %c0_2 = arith.constant 0 : index
    %c0_3 = arith.constant 0 : index
    %4 = vector.load %arg4[%c0_2, %c0_3] : memref<32x16xf32, #tpu.memory_space<vmem>>, vector<32x16xf32>
    %c0_4 = arith.constant 0 : index
    %c0_5 = arith.constant 0 : index
    %5 = vector.load %arg6[%c0_4, %c0_5] : memref<8x16xf32, #tpu.memory_space<vmem>>, vector<8x16xf32>
    %6 = arith.truncf %3 : vector<8x32xf32> to vector<8x32xbf16>
    %7 = arith.truncf %4 : vector<32x16xf32> to vector<32x16xbf16>
    %cst = arith.constant dense<0.000000e+00> : vector<8x16xf32>
    %8 = tpu.matmul %6, %7, %cst {dimension_numbers = #tpu.dot_dimension_numbers<[1], [0], [0], [1], [0, 0, 1, 1], [], []>} : vector<8x32xbf16>, vector<32x16xbf16>, vector<8x16xf32> -> vector<8x16xf32>
    %9 = arith.addf %5, %8 : vector<8x16xf32>
    %c0_6 = arith.constant 0 : index
    %c0_7 = arith.constant 0 : index
    %10 = vector.load %arg6[%c0_6, %c0_7] : memref<8x16xf32, #tpu.memory_space<vmem>>, vector<8x16xf32>
    tpu.vector_store %arg6[%c0_6, %c0_7], %9 {strides = array<i32>} : memref<8x16xf32, #tpu.memory_space<vmem>>, vector<8x16xf32>,
    return
  }
  func.func @transform_0(%arg0: i32, %arg1: i32, %arg2: i32) -> (i32, i32) {
    %c0_i32 = arith.constant 0 : i32
    return %arg0, %arg2 : i32, i32
  }
  func.func @transform_1(%arg0: i32, %arg1: i32, %arg2: i32) -> (i32, i32) {
    %c0_i32 = arith.constant 0 : i32
    return %arg2, %arg1 : i32, i32
  }
  func.func @transform_2(%arg0: i32, %arg1: i32, %arg2: i32) -> (i32, i32) {
    %c0_i32 = arith.constant 0 : i32
    %c0_i32_0 = arith.constant 0 : i32
    return %c0_i32, %arg1 : i32, i32
  }
  func.func @transform_3(%arg0: i32, %arg1: i32, %arg2: i32) -> (i32, i32) {
    %c0_i32 = arith.constant 0 : i32
    return %arg0, %arg1 : i32, i32
  }
}

</mosaic_0001>

<bundles_post_ra>
// kernel: linear_classifier.1
= control target key start
LH: loop header
LB: loop body
LE: loop exit
PB: predicated region body
PF: predicated region fallthrough
CT: control target
= control target key end

     0   :  { %v139_v3 = vmov 0.0   ;;  %vm140_vm0 = vmmov 0   ;;  %vm27_vm1 = vcmask 130048   ;;  %s194_s0 = inlined_call_operand.vmem [shape: f32[8,32], index: 0, kind: input, shape index: {}]   ;;  %s195_s1 = inlined_call_operand.vmem [shape: f32[32,16], index: 1, kind: input, shape index: {}]   ;;  %s196_s2 = inlined_call_operand.vmem [shape: f32[1,16], index: 2, kind: input, shape index: {}]   ;;  %s197_s3 = inlined_call_operand.hbm [shape: f32[8,16], index: 3, kind: output, shape index: {}]  }
   0x1   :  { %v30_v0 = vld [vmem:[%s195_s1] sm:$0xff]  ;;  %v31_v1 = vld [vmem:[%s195_s1 + $0x8] sm:$0xff]  ;;  %v32_v2 = vld [vmem:[%s195_s1 + $0x10] sm:$0xff]  ;;  %104 = vmatprep.subr.bf16.mxu0 %v139_v3  ;;  %108 = vmatprep.mubr.msk.bf16.mxu0 %vm140_vm0, %v139_v3 }
   0x2   :  { %v36_v4 = vpack.c.bf16 %v31_v1, %v30_v0  ;;  %v33_v5 = vld [vmem:[%s195_s1 + $0x18] sm:$0xff]  ;;  %v99_v6 = vld [vmem:[%s196_s2] ss:$0 sm:$0xff] }
   0x3   :  { %28 = vst.msk [vmem:[#allocation2] sm:$0xff] %vm27_vm1, %v99_v6 }
   0x4   :  { %8 = vsyncpa [#allocation3], 0  ;;  %105 = vmatpush3.bf16.msra.mxu0 %v36_v4  ;;  %v37_v7 = vpack.c.bf16 %v33_v5, %v32_v2  ;;  %v29_v8 = vld [vmem:[%s194_s0] sm:$0xff]  ;;  %vm38_vm2 = vcmask 261120   ;;  %s141_s1 = smov [#allocation2]  }
   0x5   :  { %106 = vmatprep.subr.bf16.mxu0 %v139_v3  ;;  %v35_v9 = vpack.c.bf16 %v29_v8, %v29_v8  ;;  %s91_s24 = sshll.u32 %s141_s1, 4  ;;  %s92_s24 = int_to_ptr.vmem [resolvable:$true] %s91_s24 }
   0x6   :  { %s115_s2 = scalar_lea.vmem %s92_s24, 128  ;;  %p120_p1 = scmp.lt.s32.totalorder %s92_s24, %s92_s24 }
   0x7   :  { %p116_p0 = scmp.ne.s32.totalorder %s92_s24, %s115_s2  ;;  %p121_p2 = scmp.lt.s32.totalorder %s115_s2, %s115_s2 }
   0x8   :  { %107 = vmatpush3.bf16.msra.mxu0 %v37_v7 }
   0x9   :  { %p122_p3 = por %p121_p2, %p120_p1 }
   0xa   :  { %v34_v10 = vld [vmem:[#allocation2] sm:$0xff] }
   0xb   :  { %109 = vmatmul.mubr.msk.bf16.vlgmr.msra.gmra.mrb[0].mxu0 %vm38_vm2, %v35_v9  ;;  %p123_p4 = pnand %p122_p3, %p116_p0 }
  0xde   :  { %v76_v11 = vpop.f32.mrb[0].mxu0 }
  0xdf   :  { %v82_v12 = vadd.f32 %v76_v11, %v34_v10  ;;  %v110_v13 = vpop.f32.mrb[1].mxu0 }
  0xe0   :  { %v79_v14 = vpop.f32.mrb[2].mxu0 }
  0xe1   :  { %84 = vst.msk [vmem:[#allocation2] sm:$0xff] %vm27_vm1, %v82_v12  ;;  %v111_v15 = vpop.f32.mrb[3].mxu0 }
  0xe2   :  { %126 = shalt.err (!%p123_p4)
}
  0xe3   :  { %s127_s26 = scalar_lea.hbm %s197_s3, 128 }
  0xe4   :  { %p128_p5 = scmp.ne.s32.totalorder %s197_s3, %s127_s26  ;;  %p131_p6 = scmp.lt.u32.totalorder %s127_s26, %s197_s3 }
  0xe6   :  { %p133_p7 = pnand %p131_p6, %p128_p5 }
  0xe8   :  { %136 = shalt.err (!%p133_p7)
}
  0xe9   :  { %94 = dma.vmem_to_hbm [thread:$0]  %s92_s24, 128, %s197_s3, [#allocation3]  }
  0xea   :  { %137 = dma.done.wait [#allocation3], 128  }
  0xeb   :  { %138 = vsyncadd [#allocation3], 4294967168 }
  0xec   :  { %98 = vsyncpa [#allocation3], 1 }

</bundles_post_ra>
